<compile_context>
chip_gen: v6e
topology: v6e:2x2x1
jax: 0.10.0
libtpu: 0.0.40
codegen_flags: <defaults>
</compile_context>

<pallas_src>
import functools

import jax
import jax.numpy as jnp
from jax.experimental import pallas as pl
from jax.experimental.pallas import tpu as pltpu


EPS = 1e-5          # nn.InstanceNorm2d default
NEG_SLOPE = 0.01    # nn.LeakyReLU default


def _round_up(x, m):
    return (x + m - 1) // m * m


def _samples_per_step(n):
    """Fuse the batch on single-TC chips (v5e/v6e); per-sample parallel grid on v7x."""
    try:
        kind = jax.devices()[0].device_kind.lower()
    except Exception:
        kind = ""
    if "v7" in kind:
        return 1        # 2 TensorCores/chip: shard the batch across them
    return n            # 1 TensorCore: one grid step, no per-step overhead


def _cbr_kernel(x_ref, w_ref, o_ref, *, bn, kh, kw, wp, wo, n_valid, hw_pad):
    # x_ref: (bn, Cin, Lpad)   flattened zero-padded input rows (Hp*Wp, lane-padded)
    # w_ref: (kh*kw, Cout, Cin)
    # o_ref: (bn, Cout, hw_pad) with hw_pad = Ho * Wp (valid cols have (p % Wp) < Wo)
    col = jax.lax.broadcasted_iota(jnp.int32, (1, hw_pad), 1)
    valid = (col % wp) < wo                       # (1, hw_pad) lane mask of real pixels
    inv_n = 1.0 / float(n_valid)

    for s in range(bn):                           # static (unrolled) per-sample loop
        x = x_ref[s].astype(jnp.float32)          # (Cin, Lpad)

        # Conv as 9 accumulated MXU dots: (Cout, Cin) @ (Cin, hw_pad)
        acc = None
        for dh in range(kh):
            for dw in range(kw):
                kidx = dh * kw + dw
                off = dh * wp + dw
                xs = x[:, off:off + hw_pad]                       # (Cin, hw_pad)
                wk = w_ref[kidx].astype(jnp.float32)              # (Cout, Cin)
                d = jnp.dot(wk, xs, preferred_element_type=jnp.float32)
                acc = d if acc is None else acc + d               # (Cout, hw_pad)

        # InstanceNorm2d (affine=False), biased variance, single pass over the
        # tile (sum / sum-of-squares), statistics over the valid lanes only.
        ym = jnp.where(valid, acc, 0.0)
        s1 = jnp.sum(ym, axis=1, keepdims=True)                   # (Cout, 1)
        s2 = jnp.sum(ym * ym, axis=1, keepdims=True)              # (Cout, 1)
        mean = s1 * inv_n
        var = s2 * inv_n - mean * mean
        y = (acc - mean) * jax.lax.rsqrt(var + EPS)

        # LeakyReLU(0.01)
        o_ref[s] = jnp.where(y >= 0, y, NEG_SLOPE * y).astype(o_ref.dtype)


def cbr_forward(x_nchw, weight_oihw, bias=None, *, stride=1, pad=1):
    """Conv2d -> InstanceNorm2d -> LeakyReLU.  x: [N, Cin, H, W] (NCHW).

    `bias` is accepted for API parity but unused: InstanceNorm2d(affine=False)
    exactly cancels a per-channel conv bias.
    """
    del bias
    n, cin, h, w = x_nchw.shape
    cout, cin_w, kh, kw = weight_oihw.shape
    assert cin_w == cin
    assert stride == 1, "this kernel instantiation uses stride=1"

    hp, wp = h + 2 * pad, w + 2 * pad
    ho = hp - kh + 1
    wo = wp - kw + 1
    hw_pad = ho * wp                      # compute width (valid cols: j < wo per row)
    lpad = _round_up(hp * wp + kw - 1, 128)

    # ---- glue: pad + flatten rows (no im2col / 9x HBM inflation) ----
    x_pad = jnp.pad(x_nchw.astype(jnp.float32),
                    ((0, 0), (0, 0), (pad, pad), (pad, pad)))
    x_flat = x_pad.reshape(n, cin, hp * wp)
    x_flat = jnp.pad(x_flat, ((0, 0), (0, 0), (0, lpad - hp * wp)))

    # Weight [Cout, Cin, kh, kw] -> [kh*kw, Cout, Cin]  (kidx = dh*kw + dw)
    w_mat = jnp.transpose(weight_oihw, (2, 3, 0, 1)).reshape(kh * kw, cout, cin)
    w_mat = w_mat.astype(jnp.float32)

    bn = _samples_per_step(n)             # samples per grid step
    grid = (n // bn,)

    kernel = functools.partial(
        _cbr_kernel, bn=bn, kh=kh, kw=kw, wp=wp, wo=wo,
        n_valid=ho * wo, hw_pad=hw_pad)

    out_flat = pl.pallas_call(
        kernel,
        out_shape=jax.ShapeDtypeStruct((n, cout, hw_pad), jnp.float32),
        grid_spec=pltpu.PrefetchScalarGridSpec(
            num_scalar_prefetch=0,
            grid=grid,
            in_specs=[
                pl.BlockSpec((bn, cin, lpad), lambda i: (i, 0, 0)),
                pl.BlockSpec((kh * kw, cout, cin), lambda i: (0, 0, 0)),
            ],
            out_specs=pl.BlockSpec((bn, cout, hw_pad), lambda i: (i, 0, 0)),
        ),
        compiler_params=pltpu.CompilerParams(
            dimension_semantics=("parallel",)),
    )(x_flat, w_mat)

    # (N, Cout, Ho*Wp) -> (N, Cout, Ho, Wp) -> drop the pad columns -> NCHW.
    return out_flat.reshape(n, cout, ho, wp)[:, :, :, :wo]


def _reference(x_nchw, weight_oihw, bias, *, stride=1, pad=1):
    """Pure-JAX reference (with the conv bias, to prove it cancels)."""
    y = jax.lax.conv_general_dilated(
        x_nchw.astype(jnp.float32), weight_oihw.astype(jnp.float32),
        window_strides=(stride, stride),
        padding=((pad, pad), (pad, pad)),
        dimension_numbers=("NCHW", "OIHW", "NCHW"))
    y = y + bias.reshape(1, -1, 1, 1)
    mean = jnp.mean(y, axis=(2, 3), keepdims=True)
    var = jnp.mean((y - mean) ** 2, axis=(2, 3), keepdims=True)
    yn = (y - mean) * jax.lax.rsqrt(var + EPS)
    return jnp.where(yn >= 0, yn, NEG_SLOPE * yn)


if __name__ == "__main__":
    key = jax.random.PRNGKey(0)
    k_x, k_w, k_b = jax.random.split(key, 3)

    N, Cin, H, W = 2, 4, 16, 16
    Cout, KH, KW = 8, 3, 3

    x = jax.random.normal(k_x, (N, Cin, H, W), dtype=jnp.float32)
    weight = jax.random.normal(k_w, (Cout, Cin, KH, KW), dtype=jnp.float32) * 0.1
    bias = jax.random.normal(k_b, (Cout,), dtype=jnp.float32) * 0.1

    out = cbr_forward(x, weight, bias, stride=1, pad=1)
    out = jax.block_until_ready(out)

    ref = _reference(x, weight, bias, stride=1, pad=1)
    assert out.shape == (N, Cout, H, W), out.shape
    err = float(jnp.max(jnp.abs(out - ref)))
    assert jnp.allclose(out, ref, atol=1e-3, rtol=1e-3), err

    print("KERNEL_OK")
</pallas_src>

<mosaic_0001>
module attributes {stable_mosaic.version = 11 : i64} {
  func.func @_cbr_kernel(%arg0: i32, %arg1: memref<2x4x384xf32, #tpu.memory_space<vmem>>, %arg2: memref<9x8x4xf32, #tpu.memory_space<vmem>>, %arg3: memref<2x8x288xf32, #tpu.memory_space<vmem>>) attributes {dimension_semantics = [#tpu.dimension_semantics<parallel>], iteration_bounds = array<i64: 1>, scalar_prefetch = 0 : i64, scratch_operands = 0 : i64, tpu.core_type = #tpu.core_type<tc>, window_params = [{transform_indices = @transform_0, window_bounds = array<i64: 2, 4, 384>}, {pipeline_mode = #tpu.pipeline_mode<synchronous>, transform_indices = @transform_1, window_bounds = array<i64: 9, 8, 4>}, {transform_indices = @transform_2, window_bounds = array<i64: 2, 8, 288>}]} {
    %0 = tpu.iota {dimensions = array<i32: 1>} : vector<1x288xi32>
    %c18_i32 = arith.constant 18 : i32
    %c0_i32 = arith.constant 0 : i32
    %1 = arith.cmpi eq, %c18_i32, %c0_i32 : i32
    %c1_i32 = arith.constant 1 : i32
    %2 = arith.select %1, %c1_i32, %c18_i32 : i32
    %3 = vector.broadcast %2 : i32 to vector<1x288xi32>
    %4 = arith.remsi %0, %3 : vector<1x288xi32>
    %c0_i32_0 = arith.constant 0 : i32
    %5 = vector.broadcast %c0_i32_0 : i32 to vector<1x288xi32>
    %6 = arith.cmpi ne, %4, %5 : vector<1x288xi32>
    %c0_i32_1 = arith.constant 0 : i32
    %7 = vector.broadcast %c0_i32_1 : i32 to vector<1x288xi32>
    %8 = arith.cmpi slt, %4, %7 : vector<1x288xi32>
    %c0_i32_2 = arith.constant 0 : i32
    %9 = arith.cmpi slt, %2, %c0_i32_2 : i32
    %10 = vector.broadcast %9 : i1 to vector<1x288xi1>
    %11 = vector.broadcast %10 : vector<1x288xi1> to vector<1x288xi1>
    %12 = arith.xori %8, %11 : vector<1x288xi1>
    %13 = arith.andi %12, %6 : vector<1x288xi1>
    %14 = vector.broadcast %2 : i32 to vector<1x288xi32>
    %15 = arith.addi %4, %14 : vector<1x288xi32>
    %16 = arith.select %13, %15, %4 : vector<1x288xi1>, vector<1x288xi32>
    %c16_i32 = arith.constant 16 : i32
    %17 = vector.broadcast %c16_i32 : i32 to vector<1x288xi32>
    %18 = arith.cmpi slt, %16, %17 : vector<1x288xi32>
    %c0 = arith.constant 0 : index
    %c0_3 = arith.constant 0 : index
    %c0_4 = arith.constant 0 : index
    %19 = vector.load %arg1[%c0, %c0_3, %c0_4] : memref<2x4x384xf32, #tpu.memory_space<vmem>>, vector<1x4x384xf32>
    %20 = vector.shape_cast %19 : vector<1x4x384xf32> to vector<4x384xf32>
    %21 = vector.extract_strided_slice %20 {offsets = [0, 0], sizes = [4, 288], strides = [1, 1]} : vector<4x384xf32> to vector<4x288xf32>
    %c0_5 = arith.constant 0 : index
    %c0_6 = arith.constant 0 : index
    %c0_7 = arith.constant 0 : index
    %22 = vector.load %arg2[%c0_5, %c0_6, %c0_7] : memref<9x8x4xf32, #tpu.memory_space<vmem>>, vector<1x8x4xf32>
    %23 = vector.shape_cast %22 : vector<1x8x4xf32> to vector<8x4xf32>
    %cst = arith.constant dense<0.000000e+00> : vector<8x288xf32>
    %24 = tpu.matmul %23, %21, %cst {dimension_numbers = #tpu.dot_dimension_numbers<[1], [0], [0], [1], [0, 0, 1, 1], [], []>} : vector<8x4xf32>, vector<4x288xf32>, vector<8x288xf32> -> vector<8x288xf32>
    %25 = vector.extract_strided_slice %20 {offsets = [0, 1], sizes = [4, 288], strides = [1, 1]} : vector<4x384xf32> to vector<4x288xf32>
    %c1 = arith.constant 1 : index
    %c0_8 = arith.constant 0 : index
    %c0_9 = arith.constant 0 : index
    %26 = vector.load %arg2[%c1, %c0_8, %c0_9] : memref<9x8x4xf32, #tpu.memory_space<vmem>>, vector<1x8x4xf32>
    %27 = vector.shape_cast %26 : vector<1x8x4xf32> to vector<8x4xf32>
    %cst_10 = arith.constant dense<0.000000e+00> : vector<8x288xf32>
    %28 = tpu.matmul %27, %25, %cst_10 {dimension_numbers = #tpu.dot_dimension_numbers<[1], [0], [0], [1], [0, 0, 1, 1], [], []>} : vector<8x4xf32>, vector<4x288xf32>, vector<8x288xf32> -> vector<8x288xf32>
    %29 = arith.addf %24, %28 : vector<8x288xf32>
    %30 = vector.extract_strided_slice %20 {offsets = [0, 2], sizes = [4, 288], strides = [1, 1]} : vector<4x384xf32> to vector<4x288xf32>
    %c2 = arith.constant 2 : index
    %c0_11 = arith.constant 0 : index
    %c0_12 = arith.constant 0 : index
    %31 = vector.load %arg2[%c2, %c0_11, %c0_12] : memref<9x8x4xf32, #tpu.memory_space<vmem>>, vector<1x8x4xf32>
    %32 = vector.shape_cast %31 : vector<1x8x4xf32> to vector<8x4xf32>
    %cst_13 = arith.constant dense<0.000000e+00> : vector<8x288xf32>
    %33 = tpu.matmul %32, %30, %cst_13 {dimension_numbers = #tpu.dot_dimension_numbers<[1], [0], [0], [1], [0, 0, 1, 1], [], []>} : vector<8x4xf32>, vector<4x288xf32>, vector<8x288xf32> -> vector<8x288xf32>
    %34 = arith.addf %29, %33 : vector<8x288xf32>
    %35 = vector.extract_strided_slice %20 {offsets = [0, 18], sizes = [4, 288], strides = [1, 1]} : vector<4x384xf32> to vector<4x288xf32>
    %c3 = arith.constant 3 : index
    %c0_14 = arith.constant 0 : index
    %c0_15 = arith.constant 0 : index
    %36 = vector.load %arg2[%c3, %c0_14, %c0_15] : memref<9x8x4xf32, #tpu.memory_space<vmem>>, vector<1x8x4xf32>
    %37 = vector.shape_cast %36 : vector<1x8x4xf32> to vector<8x4xf32>
    %cst_16 = arith.constant dense<0.000000e+00> : vector<8x288xf32>
    %38 = tpu.matmul %37, %35, %cst_16 {dimension_numbers = #tpu.dot_dimension_numbers<[1], [0], [0], [1], [0, 0, 1, 1], [], []>} : vector<8x4xf32>, vector<4x288xf32>, vector<8x288xf32> -> vector<8x288xf32>
    %39 = arith.addf %34, %38 : vector<8x288xf32>
    %40 = vector.extract_strided_slice %20 {offsets = [0, 19], sizes = [4, 288], strides = [1, 1]} : vector<4x384xf32> to vector<4x288xf32>
    %c4 = arith.constant 4 : index
    %c0_17 = arith.constant 0 : index
    %c0_18 = arith.constant 0 : index
    %41 = vector.load %arg2[%c4, %c0_17, %c0_18] : memref<9x8x4xf32, #tpu.memory_space<vmem>>, vector<1x8x4xf32>
    %42 = vector.shape_cast %41 : vector<1x8x4xf32> to vector<8x4xf32>
    %cst_19 = arith.constant dense<0.000000e+00> : vector<8x288xf32>
    %43 = tpu.matmul %42, %40, %cst_19 {dimension_numbers = #tpu.dot_dimension_numbers<[1], [0], [0], [1], [0, 0, 1, 1], [], []>} : vector<8x4xf32>, vector<4x288xf32>, vector<8x288xf32> -> vector<8x288xf32>
    %44 = arith.addf %39, %43 : vector<8x288xf32>
    %45 = vector.extract_strided_slice %20 {offsets = [0, 20], sizes = [4, 288], strides = [1, 1]} : vector<4x384xf32> to vector<4x288xf32>
    %c5 = arith.constant 5 : index
    %c0_20 = arith.constant 0 : index
    %c0_21 = arith.constant 0 : index
    %46 = vector.load %arg2[%c5, %c0_20, %c0_21] : memref<9x8x4xf32, #tpu.memory_space<vmem>>, vector<1x8x4xf32>
    %47 = vector.shape_cast %46 : vector<1x8x4xf32> to vector<8x4xf32>
    %cst_22 = arith.constant dense<0.000000e+00> : vector<8x288xf32>
    %48 = tpu.matmul %47, %45, %cst_22 {dimension_numbers = #tpu.dot_dimension_numbers<[1], [0], [0], [1], [0, 0, 1, 1], [], []>} : vector<8x4xf32>, vector<4x288xf32>, vector<8x288xf32> -> vector<8x288xf32>
    %49 = arith.addf %44, %48 : vector<8x288xf32>
    %50 = vector.extract_strided_slice %20 {offsets = [0, 36], sizes = [4, 288], strides = [1, 1]} : vector<4x384xf32> to vector<4x288xf32>
    %c6 = arith.constant 6 : index
    %c0_23 = arith.constant 0 : index
    %c0_24 = arith.constant 0 : index
    %51 = vector.load %arg2[%c6, %c0_23, %c0_24] : memref<9x8x4xf32, #tpu.memory_space<vmem>>, vector<1x8x4xf32>
    %52 = vector.shape_cast %51 : vector<1x8x4xf32> to vector<8x4xf32>
    %cst_25 = arith.constant dense<0.000000e+00> : vector<8x288xf32>
    %53 = tpu.matmul %52, %50, %cst_25 {dimension_numbers = #tpu.dot_dimension_numbers<[1], [0], [0], [1], [0, 0, 1, 1], [], []>} : vector<8x4xf32>, vector<4x288xf32>, vector<8x288xf32> -> vector<8x288xf32>
    %54 = arith.addf %49, %53 : vector<8x288xf32>
    %55 = vector.extract_strided_slice %20 {offsets = [0, 37], sizes = [4, 288], strides = [1, 1]} : vector<4x384xf32> to vector<4x288xf32>
    %c7 = arith.constant 7 : index
    %c0_26 = arith.constant 0 : index
    %c0_27 = arith.constant 0 : index
    %56 = vector.load %arg2[%c7, %c0_26, %c0_27] : memref<9x8x4xf32, #tpu.memory_space<vmem>>, vector<1x8x4xf32>
    %57 = vector.shape_cast %56 : vector<1x8x4xf32> to vector<8x4xf32>
    %cst_28 = arith.constant dense<0.000000e+00> : vector<8x288xf32>
    %58 = tpu.matmul %57, %55, %cst_28 {dimension_numbers = #tpu.dot_dimension_numbers<[1], [0], [0], [1], [0, 0, 1, 1], [], []>} : vector<8x4xf32>, vector<4x288xf32>, vector<8x288xf32> -> vector<8x288xf32>
    %59 = arith.addf %54, %58 : vector<8x288xf32>
    %60 = vector.extract_strided_slice %20 {offsets = [0, 38], sizes = [4, 288], strides = [1, 1]} : vector<4x384xf32> to vector<4x288xf32>
    %c8 = arith.constant 8 : index
    %c0_29 = arith.constant 0 : index
    %c0_30 = arith.constant 0 : index
    %61 = vector.load %arg2[%c8, %c0_29, %c0_30] : memref<9x8x4xf32, #tpu.memory_space<vmem>>, vector<1x8x4xf32>
    %62 = vector.shape_cast %61 : vector<1x8x4xf32> to vector<8x4xf32>
    %cst_31 = arith.constant dense<0.000000e+00> : vector<8x288xf32>
    %63 = tpu.matmul %62, %60, %cst_31 {dimension_numbers = #tpu.dot_dimension_numbers<[1], [0], [0], [1], [0, 0, 1, 1], [], []>} : vector<8x4xf32>, vector<4x288xf32>, vector<8x288xf32> -> vector<8x288xf32>
    %64 = arith.addf %59, %63 : vector<8x288xf32>
    %cst_32 = arith.constant 0.000000e+00 : f32
    %65 = vector.shape_cast %18 : vector<1x288xi1> to vector<1x288xi1>
    %66 = vector.broadcast %65 : vector<1x288xi1> to vector<8x288xi1>
    %67 = vector.broadcast %cst_32 : f32 to vector<8x288xf32>
    %68 = arith.select %66, %64, %67 : vector<8x288xi1>, vector<8x288xf32>
    %cst_33 = arith.constant dense<0.000000e+00> : vector<8xf32>
    %69 = vector.multi_reduction <add>, %68, %cst_33 [1] : vector<8x288xf32> to vector<8xf32>
    %70 = vector.shape_cast %69 : vector<8xf32> to vector<8x1xf32>
    %71 = arith.mulf %68, %68 : vector<8x288xf32>
    %cst_34 = arith.constant dense<0.000000e+00> : vector<8xf32>
    %72 = vector.multi_reduction <add>, %71, %cst_34 [1] : vector<8x288xf32> to vector<8xf32>
    %73 = vector.shape_cast %72 : vector<8xf32> to vector<8x1xf32>
    %cst_35 = arith.constant 3.906250e-03 : f32
    %74 = vector.broadcast %cst_35 : f32 to vector<8x1xf32>
    %75 = arith.mulf %70, %74 : vector<8x1xf32>
    %cst_36 = arith.constant 3.906250e-03 : f32
    %76 = vector.broadcast %cst_36 : f32 to vector<8x1xf32>
    %77 = arith.mulf %73, %76 : vector<8x1xf32>
    %78 = arith.mulf %75, %75 : vector<8x1xf32>
    %79 = arith.subf %77, %78 : vector<8x1xf32>
    %80 = vector.broadcast %75 : vector<8x1xf32> to vector<8x288xf32>
    %81 = arith.subf %64, %80 : vector<8x288xf32>
    %cst_37 = arith.constant 9.99999974E-6 : f32
    %82 = vector.broadcast %cst_37 : f32 to vector<8x1xf32>
    %83 = arith.addf %79, %82 : vector<8x1xf32>
    %84 = math.rsqrt %83 : vector<8x1xf32>
    %85 = vector.broadcast %84 : vector<8x1xf32> to vector<8x288xf32>
    %86 = arith.mulf %81, %85 : vector<8x288xf32>
    %cst_38 = arith.constant 0.000000e+00 : f32
    %87 = vector.broadcast %cst_38 : f32 to vector<8x288xf32>
    %88 = arith.cmpf oge, %86, %87 : vector<8x288xf32>
    %cst_39 = arith.constant 0.00999999977 : f32
    %89 = vector.broadcast %cst_39 : f32 to vector<8x288xf32>
    %90 = arith.mulf %89, %86 : vector<8x288xf32>
    %91 = arith.select %88, %86, %90 : vector<8x288xi1>, vector<8x288xf32>
    %c0_40 = arith.constant 0 : index
    %c0_41 = arith.constant 0 : index
    %c0_42 = arith.constant 0 : index
    %92 = vector.load %arg3[%c0_40, %c0_41, %c0_42] : memref<2x8x288xf32, #tpu.memory_space<vmem>>, vector<1x8x288xf32>
    %93 = vector.shape_cast %92 : vector<1x8x288xf32> to vector<8x288xf32>
    %94 = vector.shape_cast %91 : vector<8x288xf32> to vector<1x8x288xf32>
    tpu.vector_store %arg3[%c0_40, %c0_41, %c0_42], %94 {strides = array<i32>} : memref<2x8x288xf32, #tpu.memory_space<vmem>>, vector<1x8x288xf32>,
    %c1_43 = arith.constant 1 : index
    %c0_44 = arith.constant 0 : index
    %c0_45 = arith.constant 0 : index
    %95 = vector.load %arg1[%c1_43, %c0_44, %c0_45] : memref<2x4x384xf32, #tpu.memory_space<vmem>>, vector<1x4x384xf32>
    %96 = vector.shape_cast %95 : vector<1x4x384xf32> to vector<4x384xf32>
    %97 = vector.extract_strided_slice %96 {offsets = [0, 0], sizes = [4, 288], strides = [1, 1]} : vector<4x384xf32> to vector<4x288xf32>
    %c0_46 = arith.constant 0 : index
    %c0_47 = arith.constant 0 : index
    %c0_48 = arith.constant 0 : index
    %98 = vector.load %arg2[%c0_46, %c0_47, %c0_48] : memref<9x8x4xf32, #tpu.memory_space<vmem>>, vector<1x8x4xf32>
    %99 = vector.shape_cast %98 : vector<1x8x4xf32> to vector<8x4xf32>
    %cst_49 = arith.constant dense<0.000000e+00> : vector<8x288xf32>
    %100 = tpu.matmul %99, %97, %cst_49 {dimension_numbers = #tpu.dot_dimension_numbers<[1], [0], [0], [1], [0, 0, 1, 1], [], []>} : vector<8x4xf32>, vector<4x288xf32>, vector<8x288xf32> -> vector<8x288xf32>
    %101 = vector.extract_strided_slice %96 {offsets = [0, 1], sizes = [4, 288], strides = [1, 1]} : vector<4x384xf32> to vector<4x288xf32>
    %c1_50 = arith.constant 1 : index
    %c0_51 = arith.constant 0 : index
    %c0_52 = arith.constant 0 : index
    %102 = vector.load %arg2[%c1_50, %c0_51, %c0_52] : memref<9x8x4xf32, #tpu.memory_space<vmem>>, vector<1x8x4xf32>
    %103 = vector.shape_cast %102 : vector<1x8x4xf32> to vector<8x4xf32>
    %cst_53 = arith.constant dense<0.000000e+00> : vector<8x288xf32>
    %104 = tpu.matmul %103, %101, %cst_53 {dimension_numbers = #tpu.dot_dimension_numbers<[1], [0], [0], [1], [0, 0, 1, 1], [], []>} : vector<8x4xf32>, vector<4x288xf32>, vector<8x288xf32> -> vector<8x288xf32>
    %105 = arith.addf %100, %104 : vector<8x288xf32>
    %106 = vector.extract_strided_slice %96 {offsets = [0, 2], sizes = [4, 288], strides = [1, 1]} : vector<4x384xf32> to vector<4x288xf32>
    %c2_54 = arith.constant 2 : index
    %c0_55 = arith.constant 0 : index
    %c0_56 = arith.constant 0 : index
    %107 = vector.load %arg2[%c2_54, %c0_55, %c0_56] : memref<9x8x4xf32, #tpu.memory_space<vmem>>, vector<1x8x4xf32>
    %108 = vector.shape_cast %107 : vector<1x8x4xf32> to vector<8x4xf32>
    %cst_57 = arith.constant dense<0.000000e+00> : vector<8x288xf32>
    %109 = tpu.matmul %108, %106, %cst_57 {dimension_numbers = #tpu.dot_dimension_numbers<[1], [0], [0], [1], [0, 0, 1, 1], [], []>} : vector<8x4xf32>, vector<4x288xf32>, vector<8x288xf32> -> vector<8x288xf32>
    %110 = arith.addf %105, %109 : vector<8x288xf32>
    %111 = vector.extract_strided_slice %96 {offsets = [0, 18], sizes = [4, 288], strides = [1, 1]} : vector<4x384xf32> to vector<4x288xf32>
    %c3_58 = arith.constant 3 : index
    %c0_59 = arith.constant 0 : index
    %c0_60 = arith.constant 0 : index
    %112 = vector.load %arg2[%c3_58, %c0_59, %c0_60] : memref<9x8x4xf32, #tpu.memory_space<vmem>>, vector<1x8x4xf32>
    %113 = vector.shape_cast %112 : vector<1x8x4xf32> to vector<8x4xf32>
    %cst_61 = arith.constant dense<0.000000e+00> : vector<8x288xf32>
    %114 = tpu.matmul %113, %111, %cst_61 {dimension_numbers = #tpu.dot_dimension_numbers<[1], [0], [0], [1], [0, 0, 1, 1], [], []>} : vector<8x4xf32>, vector<4x288xf32>, vector<8x288xf32> -> vector<8x288xf32>
    %115 = arith.addf %110, %114 : vector<8x288xf32>
    %116 = vector.extract_strided_slice %96 {offsets = [0, 19], sizes = [4, 288], strides = [1, 1]} : vector<4x384xf32> to vector<4x288xf32>
    %c4_62 = arith.constant 4 : index
    %c0_63 = arith.constant 0 : index
    %c0_64 = arith.constant 0 : index
    %117 = vector.load %arg2[%c4_62, %c0_63, %c0_64] : memref<9x8x4xf32, #tpu.memory_space<vmem>>, vector<1x8x4xf32>
    %118 = vector.shape_cast %117 : vector<1x8x4xf32> to vector<8x4xf32>
    %cst_65 = arith.constant dense<0.000000e+00> : vector<8x288xf32>
    %119 = tpu.matmul %118, %116, %cst_65 {dimension_numbers = #tpu.dot_dimension_numbers<[1], [0], [0], [1], [0, 0, 1, 1], [], []>} : vector<8x4xf32>, vector<4x288xf32>, vector<8x288xf32> -> vector<8x288xf32>
    %120 = arith.addf %115, %119 : vector<8x288xf32>
    %121 = vector.extract_strided_slice %96 {offsets = [0, 20], sizes = [4, 288], strides = [1, 1]} : vector<4x384xf32> to vector<4x288xf32>
    %c5_66 = arith.constant 5 : index
    %c0_67 = arith.constant 0 : index
    %c0_68 = arith.constant 0 : index
    %122 = vector.load %arg2[%c5_66, %c0_67, %c0_68] : memref<9x8x4xf32, #tpu.memory_space<vmem>>, vector<1x8x4xf32>
    %123 = vector.shape_cast %122 : vector<1x8x4xf32> to vector<8x4xf32>
    %cst_69 = arith.constant dense<0.000000e+00> : vector<8x288xf32>
    %124 = tpu.matmul %123, %121, %cst_69 {dimension_numbers = #tpu.dot_dimension_numbers<[1], [0], [0], [1], [0, 0, 1, 1], [], []>} : vector<8x4xf32>, vector<4x288xf32>, vector<8x288xf32> -> vector<8x288xf32>
    %125 = arith.addf %120, %124 : vector<8x288xf32>
    %126 = vector.extract_strided_slice %96 {offsets = [0, 36], sizes = [4, 288], strides = [1, 1]} : vector<4x384xf32> to vector<4x288xf32>
    %c6_70 = arith.constant 6 : index
    %c0_71 = arith.constant 0 : index
    %c0_72 = arith.constant 0 : index
    %127 = vector.load %arg2[%c6_70, %c0_71, %c0_72] : memref<9x8x4xf32, #tpu.memory_space<vmem>>, vector<1x8x4xf32>
    %128 = vector.shape_cast %127 : vector<1x8x4xf32> to vector<8x4xf32>
    %cst_73 = arith.constant dense<0.000000e+00> : vector<8x288xf32>
    %129 = tpu.matmul %128, %126, %cst_73 {dimension_numbers = #tpu.dot_dimension_numbers<[1], [0], [0], [1], [0, 0, 1, 1], [], []>} : vector<8x4xf32>, vector<4x288xf32>, vector<8x288xf32> -> vector<8x288xf32>
    %130 = arith.addf %125, %129 : vector<8x288xf32>
    %131 = vector.extract_strided_slice %96 {offsets = [0, 37], sizes = [4, 288], strides = [1, 1]} : vector<4x384xf32> to vector<4x288xf32>
    %c7_74 = arith.constant 7 : index
    %c0_75 = arith.constant 0 : index
    %c0_76 = arith.constant 0 : index
    %132 = vector.load %arg2[%c7_74, %c0_75, %c0_76] : memref<9x8x4xf32, #tpu.memory_space<vmem>>, vector<1x8x4xf32>
    %133 = vector.shape_cast %132 : vector<1x8x4xf32> to vector<8x4xf32>
    %cst_77 = arith.constant dense<0.000000e+00> : vector<8x288xf32>
    %134 = tpu.matmul %133, %131, %cst_77 {dimension_numbers = #tpu.dot_dimension_numbers<[1], [0], [0], [1], [0, 0, 1, 1], [], []>} : vector<8x4xf32>, vector<4x288xf32>, vector<8x288xf32> -> vector<8x288xf32>
    %135 = arith.addf %130, %134 : vector<8x288xf32>
    %136 = vector.extract_strided_slice %96 {offsets = [0, 38], sizes = [4, 288], strides = [1, 1]} : vector<4x384xf32> to vector<4x288xf32>
    %c8_78 = arith.constant 8 : index
    %c0_79 = arith.constant 0 : index
    %c0_80 = arith.constant 0 : index
    %137 = vector.load %arg2[%c8_78, %c0_79, %c0_80] : memref<9x8x4xf32, #tpu.memory_space<vmem>>, vector<1x8x4xf32>
    %138 = vector.shape_cast %137 : vector<1x8x4xf32> to vector<8x4xf32>
    %cst_81 = arith.constant dense<0.000000e+00> : vector<8x288xf32>
    %139 = tpu.matmul %138, %136, %cst_81 {dimension_numbers = #tpu.dot_dimension_numbers<[1], [0], [0], [1], [0, 0, 1, 1], [], []>} : vector<8x4xf32>, vector<4x288xf32>, vector<8x288xf32> -> vector<8x288xf32>
    %140 = arith.addf %135, %139 : vector<8x288xf32>
    %cst_82 = arith.constant 0.000000e+00 : f32
    %141 = vector.shape_cast %18 : vector<1x288xi1> to vector<1x288xi1>
    %142 = vector.broadcast %141 : vector<1x288xi1> to vector<8x288xi1>
    %143 = vector.broadcast %cst_82 : f32 to vector<8x288xf32>
    %144 = arith.select %142, %140, %143 : vector<8x288xi1>, vector<8x288xf32>
    %cst_83 = arith.constant dense<0.000000e+00> : vector<8xf32>
    %145 = vector.multi_reduction <add>, %144, %cst_83 [1] : vector<8x288xf32> to vector<8xf32>
    %146 = vector.shape_cast %145 : vector<8xf32> to vector<8x1xf32>
    %147 = arith.mulf %144, %144 : vector<8x288xf32>
    %cst_84 = arith.constant dense<0.000000e+00> : vector<8xf32>
    %148 = vector.multi_reduction <add>, %147, %cst_84 [1] : vector<8x288xf32> to vector<8xf32>
    %149 = vector.shape_cast %148 : vector<8xf32> to vector<8x1xf32>
    %cst_85 = arith.constant 3.906250e-03 : f32
    %150 = vector.broadcast %cst_85 : f32 to vector<8x1xf32>
    %151 = arith.mulf %146, %150 : vector<8x1xf32>
    %cst_86 = arith.constant 3.906250e-03 : f32
    %152 = vector.broadcast %cst_86 : f32 to vector<8x1xf32>
    %153 = arith.mulf %149, %152 : vector<8x1xf32>
    %154 = arith.mulf %151, %151 : vector<8x1xf32>
    %155 = arith.subf %153, %154 : vector<8x1xf32>
    %156 = vector.broadcast %151 : vector<8x1xf32> to vector<8x288xf32>
    %157 = arith.subf %140, %156 : vector<8x288xf32>
    %cst_87 = arith.constant 9.99999974E-6 : f32
    %158 = vector.broadcast %cst_87 : f32 to vector<8x1xf32>
    %159 = arith.addf %155, %158 : vector<8x1xf32>
    %160 = math.rsqrt %159 : vector<8x1xf32>
    %161 = vector.broadcast %160 : vector<8x1xf32> to vector<8x288xf32>
    %162 = arith.mulf %157, %161 : vector<8x288xf32>
    %cst_88 = arith.constant 0.000000e+00 : f32
    %163 = vector.broadcast %cst_88 : f32 to vector<8x288xf32>
    %164 = arith.cmpf oge, %162, %163 : vector<8x288xf32>
    %cst_89 = arith.constant 0.00999999977 : f32
    %165 = vector.broadcast %cst_89 : f32 to vector<8x288xf32>
    %166 = arith.mulf %165, %162 : vector<8x288xf32>
    %167 = arith.select %164, %162, %166 : vector<8x288xi1>, vector<8x288xf32>
    %c1_90 = arith.constant 1 : index
    %c0_91 = arith.constant 0 : index
    %c0_92 = arith.constant 0 : index
    %168 = vector.load %arg3[%c1_90, %c0_91, %c0_92] : memref<2x8x288xf32, #tpu.memory_space<vmem>>, vector<1x8x288xf32>
    %169 = vector.shape_cast %168 : vector<1x8x288xf32> to vector<8x288xf32>
    %170 = vector.shape_cast %167 : vector<8x288xf32> to vector<1x8x288xf32>
    tpu.vector_store %arg3[%c1_90, %c0_91, %c0_92], %170 {strides = array<i32>} : memref<2x8x288xf32, #tpu.memory_space<vmem>>, vector<1x8x288xf32>,
    return
  }
  func.func @transform_0(%arg0: i32) -> (i32, i32, i32) {
    %c0_i32 = arith.constant 0 : i32
    %c0_i32_0 = arith.constant 0 : i32
    %c0_i32_1 = arith.constant 0 : i32
    return %arg0, %c0_i32, %c0_i32_0 : i32, i32, i32
  }
  func.func @transform_1(%arg0: i32) -> (i32, i32, i32) {
    %c0_i32 = arith.constant 0 : i32
    %c0_i32_0 = arith.constant 0 : i32
    %c0_i32_1 = arith.constant 0 : i32
    %c0_i32_2 = arith.constant 0 : i32
    return %c0_i32, %c0_i32_0, %c0_i32_1 : i32, i32, i32
  }
  func.func @transform_2(%arg0: i32) -> (i32, i32, i32) {
    %c0_i32 = arith.constant 0 : i32
    %c0_i32_0 = arith.constant 0 : i32
    %c0_i32_1 = arith.constant 0 : i32
    return %arg0, %c0_i32, %c0_i32_0 : i32, i32, i32
  }
}

</mosaic_0001>

<bundles_post_ra>
// kernel: tpu_custom_call.1
= control target key start
LH: loop header
LB: loop body
LE: loop exit
PB: predicated region body
PF: predicated region fallthrough
CT: control target
= control target key end

     0   :  { %s3369_s11 = smov 127   ;;  %v3370_v2 = vmov 0.0   ;;  %vm3371_vm0 = vmmov 0   ;;  %s3881_s0 = inlined_call_operand.vmem [shape: f32[2,4,384], index: 0, kind: input, shape index: {}]   ;;  %s3882_s1 = inlined_call_operand.vmem [shape: f32[9,8,4], index: 1, kind: input, shape index: {}]   ;;  %s3883_s2 = inlined_call_operand.hbm [shape: f32[2,8,288], index: 2, kind: output, shape index: {}]  }
   0x1   :  { %v3400_v0 = vld [vmem:[%s3881_s0] sm:$0xff]  ;;  %3232 = vmatprep.subr.mxu1 %v3370_v2  ;;  %159 = vmatprep.mubr.f32.mxu0 %v3370_v2  ;;  %v3417_v3 = vld [vmem:[%s3881_s0 + $0x8] sm:$0xf] }
   0x2   :  { %75 = vrot.lane.b32.xlu1 %v3400_v0, %s3369_s11  ;;  %v3406_v1 = vcombine.high %v3400_v0, %v3400_v0  ;;  %3234 = vmatprep.mubr.msk.f32.mxu1 %vm3371_vm0, %v3370_v2 }
   0x4   :  { %77 = vrot.lane.b32.xlu0 %v3406_v1, %s3369_s11 }
   0x5   :  { %7 = vsyncpa [#allocation3], 0  ;;  %s3372_s14 = smov 126   ;;  %s3373_s15 = smov 110   ;;  %v3462_v4 = vld [vmem:[%s3881_s0 + $0xc] sm:$0xff]  ;;  %vm88_vm1 = vcmask 1043456  }
   0x6   :  { %390 = vrot.lane.b32.xlu1 %v3406_v1, %s3372_s14  ;;  %s3374_s16 = smov 109   ;;  %s3375_s17 = smov 108   ;;  %v3469_v5 = vld [vmem:[%s3881_s0 + $0x14] sm:$0xf]  ;;  %v3475_v6 = vcombine.high %v3462_v4, %v3462_v4  ;;  %vm81_vm2 = vcmask 1039360   ;;  %v3528_v10 = vld [vmem:[%s3882_s1 + $0x8] sm:$0xff] }
   0x7   :  { %s3376_s18 = smov 92   ;;  %s3377_s19 = smov 91   ;;  %vm84_vm3 = vcmask 31744   ;;  %vm394_vm4 = vcmask 1031168   ;;  %v3545_v16 = vld [vmem:[%s3882_s1] sm:$0xff]  ;;  %vm558_vm5 = vcmask 900096  }
   0x8   :  { %79 = vrot.lane.b32.xlu0 %v3417_v3, %s3369_s11  ;;  %s3378_s20 = smov 90   ;;  %v3563_v20 = vld [vmem:[%s3882_s1 + $0x10] sm:$0xff]  ;;  %v3581_v25 = vld [vmem:[%s3882_s1 + $0x18] sm:$0xff]  ;;  %vm722_vm6 = vcmask 891904   ;;  %v3598_v29 = vld [vmem:[%s3882_s1 + $0x20] sm:$0xff]  ;;  %vm886_vm7 = vcmask 883712  }
   0x9   :  { %v3615_v34 = vld [vmem:[%s3882_s1 + $0x28] sm:$0xff]  ;;  %vm1050_vm8 = vcmask 752640   ;;  %v3639_v42 = vld [vmem:[%s3882_s1 + $0x30] sm:$0xff]  ;;  %vm1214_vm9 = vcmask 744448   ;;  %v3653_v46 = vld [vmem:[%s3882_s1 + $0x38] sm:$0xff]  ;;  %vm1378_vm10 = vcmask 736256  }
   0xa   :  { %388 = vrot.lane.b32.xlu1 %v3400_v0, %s3372_s14  ;;  %v3672_v52 = vld [vmem:[%s3882_s1 + $0x40] sm:$0xff]  ;;  %s3379_s1 = smov [#allocation2]  }
   0xc   :  { %392 = vrot.lane.b32.xlu0 %v3417_v3, %s3372_s14 }
   0xe   :  { %556 = vrot.lane.b32.xlu1 %v3417_v3, %s3373_s15 }
  0x10   :  { %554 = vrot.lane.b32.xlu0 %v3406_v1, %s3373_s15 }
  0x12   :  { %718 = vrot.lane.b32.xlu1 %v3406_v1, %s3374_s16 }
  0x14   :  { %552 = vrot.lane.b32.xlu0 %v3400_v0, %s3373_s15 }
  0x16   :  { %716 = vrot.lane.b32.xlu1 %v3400_v0, %s3374_s16 }
  0x18   :  { %720 = vrot.lane.b32.xlu0 %v3417_v3, %s3374_s16 }
  0x1a   :  { %884 = vrot.lane.b32.xlu1 %v3417_v3, %s3375_s17 }
  0x1c   :  { %882 = vrot.lane.b32.xlu0 %v3406_v1, %s3375_s17 }
  0x1e   :  { %1046 = vrot.lane.b32.xlu1 %v3406_v1, %s3376_s18 }
  0x20   :  { %880 = vrot.lane.b32.xlu0 %v3400_v0, %s3375_s17 }
  0x22   :  { %1044 = vrot.lane.b32.xlu1 %v3400_v0, %s3376_s18 }
  0x24   :  { %1048 = vrot.lane.b32.xlu0 %v3417_v3, %s3376_s18 }
  0x26   :  { %1212 = vrot.lane.b32.xlu1 %v3417_v3, %s3377_s19 }
  0x28   :  { %1210 = vrot.lane.b32.xlu0 %v3406_v1, %s3377_s19 }
  0x2a   :  { %1374 = vrot.lane.b32.xlu1 %v3406_v1, %s3378_s20 }
  0x2c   :  { %1208 = vrot.lane.b32.xlu0 %v3400_v0, %s3377_s19 }
  0x2e   :  { %1372 = vrot.lane.b32.xlu1 %v3400_v0, %s3378_s20 }
  0x30   :  { %1376 = vrot.lane.b32.xlu0 %v3417_v3, %s3378_s20 }
  0x32   :  { %1593 = vrot.lane.b32.xlu1 %v3469_v5, %s3369_s11 }
  0x34   :  { %1591 = vrot.lane.b32.xlu0 %v3475_v6, %s3369_s11 }
  0x36   :  { %1900 = vrot.lane.b32.xlu1 %v3475_v6, %s3372_s14 }
  0x38   :  { %1589 = vrot.lane.b32.xlu0 %v3462_v4, %s3369_s11 }
  0x3a   :  { %1898 = vrot.lane.b32.xlu1 %v3462_v4, %s3372_s14 }
  0x3c   :  { %1902 = vrot.lane.b32.xlu0 %v3469_v5, %s3372_s14  ;;  %s3077_s14 = sshll.u32 %s3379_s1, 4  ;;  %s3078_s14 = int_to_ptr.vmem [resolvable:$true] %s3077_s14 }
  0x3d   :  { %p3352_p1 = scmp.lt.s32.totalorder %s3078_s14, %s3078_s14 }
  0x3e   :  { %2064 = vrot.lane.b32.xlu1 %v3469_v5, %s3373_s15 }
  0x40   :  { %2062 = vrot.lane.b32.xlu0 %v3475_v6, %s3373_s15 }
  0x42   :  { %2224 = vrot.lane.b32.xlu1 %v3475_v6, %s3374_s16 }
  0x44   :  { %2060 = vrot.lane.b32.xlu0 %v3462_v4, %s3373_s15  ;;  %s3347_s15 = scalar_lea.vmem %s3078_s14, 768 }
  0x45   :  { %p3348_p0 = scmp.ne.s32.totalorder %s3078_s14, %s3347_s15  ;;  %p3353_p2 = scmp.lt.s32.totalorder %s3347_s15, %s3347_s15 }
  0x46   :  { %2222 = vrot.lane.b32.xlu1 %v3462_v4, %s3374_s16 }
  0x47   :  { %p3354_p3 = por %p3353_p2, %p3352_p1 }
  0x48   :  { %2226 = vrot.lane.b32.xlu0 %v3469_v5, %s3374_s16 }
  0x49   :  { %p3355_p4 = pnand %p3354_p3, %p3348_p0 }
  0x4a   :  { %2388 = vrot.lane.b32.xlu1 %v3469_v5, %s3375_s17 }
  0x4c   :  { %2386 = vrot.lane.b32.xlu0 %v3475_v6, %s3375_s17 }
  0x4e   :  { %2548 = vrot.lane.b32.xlu1 %v3475_v6, %s3376_s18 }
  0x50   :  { %2384 = vrot.lane.b32.xlu0 %v3462_v4, %s3375_s17 }
  0x52   :  { %2546 = vrot.lane.b32.xlu1 %v3462_v4, %s3376_s18 }
  0x54   :  { %2550 = vrot.lane.b32.xlu0 %v3469_v5, %s3376_s18 }
  0x56   :  { %2712 = vrot.lane.b32.xlu1 %v3469_v5, %s3377_s19 }
  0x58   :  { %2710 = vrot.lane.b32.xlu0 %v3475_v6, %s3377_s19 }
  0x5a   :  { %2872 = vrot.lane.b32.xlu1 %v3475_v6, %s3378_s20 }
  0x5c   :  { %2708 = vrot.lane.b32.xlu0 %v3462_v4, %s3377_s19 }
  0x5e   :  { %2870 = vrot.lane.b32.xlu1 %v3462_v4, %s3378_s20 }
  0x60   :  { %2874 = vrot.lane.b32.xlu0 %v3469_v5, %s3378_s20 }
  0x74   :  { %v76_v7 = vpop.permute.xlu1 %75 }
  0x76   :  { %v78_v8 = vpop.permute.xlu0 %77 }
  0x77   :  { %v82_v14 = vsel %vm81_vm2, %v76_v7, %v78_v8 }
  0x78   :  { %v391_v9 = vpop.permute.xlu1 %390 }
  0x7a   :  { %v80_v11 = vpop.permute.xlu0 %79 }
  0x7b   :  { %3233 = vmatpush3.msk.msra.mxu1 %vm88_vm1, %v80_v11  ;;  %v83_v12 = vsel %vm81_vm2, %v78_v8, %v80_v11 }
  0x7c   :  { %v389_v13 = vpop.permute.xlu1 %388  ;;  %3089 = vmatprep.subr.msk.mxu0 %vm88_vm1, %v83_v12  ;;  %3235 = vmatmul.mubr.msk.f32.vlgmr.msra.gmra.mxu1 %vm84_vm3, %v3528_v10 }
  0x7d   :  { %3090 = vmatpush1.msk.msra.mxu0 %vm88_vm1, %v82_v14  ;;  %3237 = vmatprep.subr.mxu1 %v3370_v2  ;;  %v395_v21 = vsel %vm394_vm4, %v389_v13, %v391_v9 }
  0x7e   :  { %3091 = vmatmul.mubr.msk.f32.vlgmr.msra.gmra.mxu0 %vm84_vm3, %v3528_v10  ;;  %3094 = vmatprep.subr.msk.mxu0 %vm88_vm1, %v3406_v1  ;;  %v393_v15 = vpop.permute.xlu0 %392 }
  0x7f   :  { %3238 = vmatpush3.msk.msra.mxu1 %vm88_vm1, %v3417_v3  ;;  %v396_v17 = vsel %vm394_vm4, %v391_v9, %v393_v15  ;;  %3095 = vmatpush1.msk.msra.mxu0 %vm88_vm1, %v3400_v0 }
  0x80   :  { %3239 = vmatprep.mubr.msk.f32.mxu1 %vm3371_vm0, %v3370_v2  ;;  %3242 = vmatprep.subr.mxu1 %v3370_v2  ;;  %v557_v18 = vpop.permute.xlu1 %556 }
  0x81   :  { %3240 = vmatmul.mubr.msk.f32.vlgmr.msra.gmra.mxu1 %vm84_vm3, %v3545_v16  ;;  %3100 = vmatprep.subr.msk.mxu0 %vm88_vm1, %v396_v17 }
  0x82   :  { %3243 = vmatpush3.msk.msra.mxu1 %vm88_vm1, %v393_v15  ;;  %309 = vmatprep.mubr.f32.mxu0 %v3370_v2  ;;  %v555_v19 = vpop.permute.xlu0 %554 }
  0x83   :  { %3096 = vmatmul.mubr.msk.f32.vlgmr.msra.gmra.mxu0 %vm84_vm3, %v3545_v16  ;;  %v560_v22 = vsel %vm558_vm5, %v555_v19, %v557_v18  ;;  %3244 = vmatprep.mubr.msk.f32.mxu1 %vm3371_vm0, %v3370_v2 }
  0x84   :  { %3101 = vmatpush1.msk.msra.mxu0 %vm88_vm1, %v395_v21  ;;  %3247 = vmatprep.subr.mxu1 %v3370_v2  ;;  %v719_v23 = vpop.permute.xlu1 %718 }
  0x85   :  { %3245 = vmatmul.mubr.msk.f32.vlgmr.msra.gmra.mxu1 %vm84_vm3, %v3563_v20  ;;  %3106 = vmatprep.subr.msk.mxu0 %vm88_vm1, %v560_v22 }
  0x86   :  { %3248 = vmatpush3.msk.msra.mxu1 %vm88_vm1, %v557_v18  ;;  %v553_v24 = vpop.permute.xlu0 %552  ;;  %470 = vmatprep.mubr.f32.mxu0 %v3370_v2 }
  0x87   :  { %v559_v26 = vsel %vm558_vm5, %v553_v24, %v555_v19  ;;  %3102 = vmatmul.mubr.msk.f32.vlgmr.msra.gmra.mxu0 %vm84_vm3, %v3563_v20  ;;  %3249 = vmatprep.mubr.msk.f32.mxu1 %vm3371_vm0, %v3370_v2 }
  0x88   :  { %v717_v27 = vpop.permute.xlu1 %716  ;;  %3107 = vmatpush1.msk.msra.mxu0 %vm88_vm1, %v559_v26  ;;  %3252 = vmatprep.subr.mxu1 %v3370_v2 }
  0x89   :  { %3250 = vmatmul.mubr.msk.f32.vlgmr.msra.gmra.mxu1 %vm84_vm3, %v3581_v25  ;;  %634 = vmatprep.mubr.f32.mxu0 %v3370_v2  ;;  %v723_v31 = vsel %vm722_vm6, %v717_v27, %v719_v23 }
  0x8a   :  { %v721_v28 = vpop.permute.xlu0 %720  ;;  %3254 = vmatprep.mubr.msk.f32.mxu1 %vm3371_vm0, %v3370_v2 }
  0x8b   :  { %v724_v30 = vsel %vm722_vm6, %v719_v23, %v721_v28  ;;  %3253 = vmatpush3.msk.msra.mxu1 %vm88_vm1, %v721_v28  ;;  %3108 = vmatmul.mubr.msk.f32.vlgmr.msra.gmra.mxu0 %vm84_vm3, %v3581_v25 }
  0x8c   :  { %v885_v32 = vpop.permute.xlu1 %884  ;;  %3112 = vmatprep.subr.msk.mxu0 %vm88_vm1, %v724_v30  ;;  %3257 = vmatprep.subr.mxu1 %v3370_v2 }
  0x8d   :  { %3113 = vmatpush1.msk.msra.mxu0 %vm88_vm1, %v723_v31  ;;  %3255 = vmatmul.mubr.msk.f32.vlgmr.msra.gmra.mxu1 %vm84_vm3, %v3598_v29 }
  0x8e   :  { %v883_v33 = vpop.permute.xlu0 %882  ;;  %3258 = vmatpush3.msk.msra.mxu1 %vm88_vm1, %v885_v32  ;;  %798 = vmatprep.mubr.f32.mxu0 %v3370_v2 }
  0x8f   :  { %v888_v35 = vsel %vm886_vm7, %v883_v33, %v885_v32  ;;  %3114 = vmatmul.mubr.msk.f32.vlgmr.msra.gmra.mxu0 %vm84_vm3, %v3598_v29  ;;  %3259 = vmatprep.mubr.msk.f32.mxu1 %vm3371_vm0, %v3370_v2 }
  0x90   :  { %v1047_v36 = vpop.permute.xlu1 %1046  ;;  %3118 = vmatprep.subr.msk.mxu0 %vm88_vm1, %v888_v35  ;;  %3262 = vmatprep.subr.mxu1 %v3370_v2 }
  0x91   :  { %3260 = vmatmul.mubr.msk.f32.vlgmr.msra.gmra.mxu1 %vm84_vm3, %v3615_v34  ;;  %962 = vmatprep.mubr.f32.mxu0 %v3370_v2 }
  0x92   :  { %v881_v37 = vpop.permute.xlu0 %880  ;;  %3264 = vmatprep.mubr.msk.f32.mxu1 %vm3371_vm0, %v3370_v2 }
  0x93   :  { %v887_v38 = vsel %vm886_vm7, %v881_v37, %v883_v33 }
  0x94   :  { %v1045_v39 = vpop.permute.xlu1 %1044  ;;  %3119 = vmatpush1.msk.msra.mxu0 %vm88_vm1, %v887_v38 }
  0x95   :  { %3120 = vmatmul.mubr.msk.f32.vlgmr.msra.gmra.mxu0 %vm84_vm3, %v3615_v34  ;;  %v1051_v43 = vsel %vm1050_vm8, %v1045_v39, %v1047_v36 }
  0x96   :  { %v1049_v40 = vpop.permute.xlu0 %1048  ;;  %1126 = vmatprep.mubr.f32.mxu0 %v3370_v2 }
  0x97   :  { %v1052_v41 = vsel %vm1050_vm8, %v1047_v36, %v1049_v40  ;;  %3263 = vmatpush3.msk.msra.mxu1 %vm88_vm1, %v1049_v40 }
  0x98   :  { %v1213_v44 = vpop.permute.xlu1 %1212  ;;  %3124 = vmatprep.subr.msk.mxu0 %vm88_vm1, %v1052_v41  ;;  %3267 = vmatprep.subr.mxu1 %v3370_v2 }
  0x99   :  { %3125 = vmatpush1.msk.msra.mxu0 %vm88_vm1, %v1051_v43  ;;  %3265 = vmatmul.mubr.msk.f32.vlgmr.msra.gmra.mxu1 %vm84_vm3, %v3639_v42 }
  0x9a   :  { %v1211_v45 = vpop.permute.xlu0 %1210  ;;  %3268 = vmatpush3.msk.msra.mxu1 %vm88_vm1, %v1213_v44  ;;  %3126 = vmatmul.mubr.msk.f32.vlgmr.msra.gmra.mxu0 %vm84_vm3, %v3639_v42 }
  0x9b   :  { %v1216_v47 = vsel %vm1214_vm9, %v1211_v45, %v1213_v44  ;;  %1290 = vmatprep.mubr.f32.mxu0 %v3370_v2  ;;  %3269 = vmatprep.mubr.msk.f32.mxu1 %vm3371_vm0, %v3370_v2 }
  0x9c   :  { %v1375_v48 = vpop.permute.xlu1 %1374  ;;  %3130 = vmatprep.subr.msk.mxu0 %vm88_vm1, %v1216_v47  ;;  %3272 = vmatprep.subr.mxu1 %v3370_v2 }
  0x9d   :  { %3270 = vmatmul.mubr.msk.f32.vlgmr.msra.gmra.mxu1 %vm84_vm3, %v3653_v46 }
  0x9e   :  { %v1209_v49 = vpop.permute.xlu0 %1208  ;;  %3274 = vmatprep.mubr.msk.f32.mxu1 %vm3371_vm0, %v3370_v2 }
  0x9f   :  { %v1215_v50 = vsel %vm1214_vm9, %v1209_v49, %v1211_v45 }
  0xa0   :  { %v1373_v51 = vpop.permute.xlu1 %1372  ;;  %3131 = vmatpush1.msk.msra.mxu0 %vm88_vm1, %v1215_v50 }
  0xa1   :  { %3132 = vmatmul.mubr.msk.f32.vlgmr.msra.gmra.mxu0 %vm84_vm3, %v3653_v46  ;;  %v1379_v55 = vsel %vm1378_vm10, %v1373_v51, %v1375_v48 }
  0xa2   :  { %v1377_v53 = vpop.permute.xlu0 %1376  ;;  %1454 = vmatprep.mubr.f32.mxu0 %v3370_v2 }
  0xa3   :  { %v1380_v54 = vsel %vm1378_vm10, %v1375_v48, %v1377_v53  ;;  %3273 = vmatpush3.msk.msra.mxu1 %vm88_vm1, %v1377_v53 }
  0xa4   :  { %v1594_v56 = vpop.permute.xlu1 %1593  ;;  %3136 = vmatprep.subr.msk.mxu0 %vm88_vm1, %v1380_v54  ;;  %3275 = vmatmul.mubr.msk.f32.vlgmr.msra.gmra.mxu1 %vm84_vm3, %v3672_v52 }
  0xa5   :  { %3137 = vmatpush1.msk.msra.mxu0 %vm88_vm1, %v1379_v55  ;;  %3277 = vmatprep.subr.mxu1 %v3370_v2 }
  0xa6   :  { %3138 = vmatmul.mubr.msk.f32.vlgmr.msra.gmra.mxu0 %vm84_vm3, %v3672_v52  ;;  %v1592_v57 = vpop.permute.xlu0 %1591  ;;  %3278 = vmatpush3.msk.msra.mxu1 %vm88_vm1, %v1594_v56 }
  0xa7   :  { %v1596_v58 = vsel %vm81_vm2, %v1592_v57, %v1594_v56  ;;  %3279 = vmatprep.mubr.msk.f32.mxu1 %vm3371_vm0, %v3370_v2  ;;  %1670 = vmatprep.mubr.f32.mxu0 %v3370_v2 }
  0xa8   :  { %v1901_v59 = vpop.permute.xlu1 %1900  ;;  %3144 = vmatprep.subr.msk.mxu0 %vm88_vm1, %v1596_v58  ;;  %3280 = vmatmul.mubr.msk.f32.vlgmr.msra.gmra.mxu1 %vm84_vm3, %v3528_v10 }
  0xa9   :  { %3282 = vmatprep.subr.mxu1 %v3370_v2  ;;  %3284 = vmatprep.mubr.msk.f32.mxu1 %vm3371_vm0, %v3370_v2 }
  0xaa   :  { %v1590_v60 = vpop.permute.xlu0 %1589  ;;  %3283 = vmatpush3.msk.msra.mxu1 %vm88_vm1, %v3469_v5 }
  0xab   :  { %v1595_v61 = vsel %vm81_vm2, %v1590_v60, %v1592_v57  ;;  %3287 = vmatprep.subr.mxu1 %v3370_v2 }
  0xac   :  { %v1899_v62 = vpop.permute.xlu1 %1898  ;;  %3145 = vmatpush1.msk.msra.mxu0 %vm88_vm1, %v1595_v61  ;;  %3285 = vmatmul.mubr.msk.f32.vlgmr.msra.gmra.mxu1 %vm84_vm3, %v3545_v16 }
  0xad   :  { %3146 = vmatmul.mubr.msk.f32.vlgmr.msra.gmra.mxu0 %vm84_vm3, %v3528_v10  ;;  %3149 = vmatprep.subr.msk.mxu0 %vm88_vm1, %v3475_v6  ;;  %v1904_v3 = vsel %vm394_vm4, %v1899_v62, %v1901_v59 }
  0xae   :  { %v1903_v63 = vpop.permute.xlu0 %1902  ;;  %3150 = vmatpush1.msk.msra.mxu0 %vm88_vm1, %v3462_v4  ;;  %1820 = vmatprep.mubr.f32.mxu0 %v3370_v2 }
  0xaf   :  { %v1905_v0 = vsel %vm394_vm4, %v1901_v59, %v1903_v63  ;;  %3288 = vmatpush3.msk.msra.mxu1 %vm88_vm1, %v1903_v63  ;;  %3289 = vmatprep.mubr.msk.f32.mxu1 %vm3371_vm0, %v3370_v2 }
  0xb0   :  { %v2065_v1 = vpop.permute.xlu1 %2064  ;;  %3155 = vmatprep.subr.msk.mxu0 %vm88_vm1, %v1905_v0  ;;  %3292 = vmatprep.subr.mxu1 %v3370_v2 }
  0xb1   :  { %3151 = vmatmul.mubr.msk.f32.vlgmr.msra.gmra.mxu0 %vm84_vm3, %v3545_v16  ;;  %3290 = vmatmul.mubr.msk.f32.vlgmr.msra.gmra.mxu1 %vm84_vm3, %v3563_v20 }
  0xb2   :  { %3156 = vmatpush1.msk.msra.mxu0 %vm88_vm1, %v1904_v3  ;;  %v2063_v4 = vpop.permute.xlu0 %2062  ;;  %3293 = vmatpush3.msk.msra.mxu1 %vm88_vm1, %v2065_v1 }
  0xb3   :  { %v2067_v5 = vsel %vm558_vm5, %v2063_v4, %v2065_v1  ;;  %1979 = vmatprep.mubr.f32.mxu0 %v3370_v2  ;;  %3294 = vmatprep.mubr.msk.f32.mxu1 %vm3371_vm0, %v3370_v2 }
  0xb4   :  { %v2225_v6 = vpop.permute.xlu1 %2224  ;;  %3161 = vmatprep.subr.msk.mxu0 %vm88_vm1, %v2067_v5  ;;  %3297 = vmatprep.subr.mxu1 %v3370_v2 }
  0xb5   :  { %3157 = vmatmul.mubr.msk.f32.vlgmr.msra.gmra.mxu0 %vm84_vm3, %v3563_v20  ;;  %3295 = vmatmul.mubr.msk.f32.vlgmr.msra.gmra.mxu1 %vm84_vm3, %v3581_v25 }
  0xb6   :  { %v2061_v7 = vpop.permute.xlu0 %2060  ;;  %2141 = vmatprep.mubr.f32.mxu0 %v3370_v2  ;;  %3299 = vmatprep.mubr.msk.f32.mxu1 %vm3371_vm0, %v3370_v2 }
  0xb7   :  { %v2066_v8 = vsel %vm558_vm5, %v2061_v7, %v2063_v4 }
  0xb8   :  { %v2223_v9 = vpop.permute.xlu1 %2222  ;;  %3162 = vmatpush1.msk.msra.mxu0 %vm88_vm1, %v2066_v8 }
  0xb9   :  { %3163 = vmatmul.mubr.msk.f32.vlgmr.msra.gmra.mxu0 %vm84_vm3, %v3581_v25  ;;  %v2228_v12 = vsel %vm722_vm6, %v2223_v9, %v2225_v6 }
  0xba   :  { %v2227_v10 = vpop.permute.xlu0 %2226  ;;  %2303 = vmatprep.mubr.f32.mxu0 %v3370_v2 }
  0xbb   :  { %v2229_v11 = vsel %vm722_vm6, %v2225_v6, %v2227_v10  ;;  %3298 = vmatpush3.msk.msra.mxu1 %vm88_vm1, %v2227_v10 }
  0xbc   :  { %v2389_v13 = vpop.permute.xlu1 %2388  ;;  %3167 = vmatprep.subr.msk.mxu0 %vm88_vm1, %v2229_v11  ;;  %3302 = vmatprep.subr.mxu1 %v3370_v2 }
  0xbd   :  { %3168 = vmatpush1.msk.msra.mxu0 %vm88_vm1, %v2228_v12  ;;  %3300 = vmatmul.mubr.msk.f32.vlgmr.msra.gmra.mxu1 %vm84_vm3, %v3598_v29 }
  0xbe   :  { %3169 = vmatmul.mubr.msk.f32.vlgmr.msra.gmra.mxu0 %vm84_vm3, %v3598_v29  ;;  %v2387_v14 = vpop.permute.xlu0 %2386  ;;  %3303 = vmatpush3.msk.msra.mxu1 %vm88_vm1, %v2389_v13 }
  0xbf   :  { %v2391_v15 = vsel %vm886_vm7, %v2387_v14, %v2389_v13  ;;  %3304 = vmatprep.mubr.msk.f32.mxu1 %vm3371_vm0, %v3370_v2  ;;  %2465 = vmatprep.mubr.f32.mxu0 %v3370_v2 }
  0xc0   :  { %v2549_v16 = vpop.permute.xlu1 %2548  ;;  %3173 = vmatprep.subr.msk.mxu0 %vm88_vm1, %v2391_v15  ;;  %3307 = vmatprep.subr.mxu1 %v3370_v2 }
  0xc1   :  { %3305 = vmatmul.mubr.msk.f32.vlgmr.msra.gmra.mxu1 %vm84_vm3, %v3615_v34 }
  0xc2   :  { %v2385_v17 = vpop.permute.xlu0 %2384  ;;  %3309 = vmatprep.mubr.msk.f32.mxu1 %vm3371_vm0, %v3370_v2 }
  0xc3   :  { %v2390_v18 = vsel %vm886_vm7, %v2385_v17, %v2387_v14  ;;  %vm1544_vm7 = vcmask 261120  }
  0xc4   :  { %v2547_v19 = vpop.permute.xlu1 %2546  ;;  %3174 = vmatpush1.msk.msra.mxu0 %vm88_vm1, %v2390_v18 }
  0xc5   :  { %3175 = vmatmul.mubr.msk.f32.vlgmr.msra.gmra.mxu0 %vm84_vm3, %v3615_v34  ;;  %v2552_v22 = vsel %vm1050_vm8, %v2547_v19, %v2549_v16 }
  0xc6   :  { %v2551_v20 = vpop.permute.xlu0 %2550  ;;  %2627 = vmatprep.mubr.f32.mxu0 %v3370_v2 }
  0xc7   :  { %v2553_v21 = vsel %vm1050_vm8, %v2549_v16, %v2551_v20  ;;  %3308 = vmatpush3.msk.msra.mxu1 %vm88_vm1, %v2551_v20 }
  0xc8   :  { %v2713_v23 = vpop.permute.xlu1 %2712  ;;  %3179 = vmatprep.subr.msk.mxu0 %vm88_vm1, %v2553_v21  ;;  %3310 = vmatmul.mubr.msk.f32.vlgmr.msra.gmra.mxu1 %vm84_vm3, %v3639_v42 }
  0xc9   :  { %3180 = vmatpush1.msk.msra.mxu0 %vm88_vm1, %v2552_v22  ;;  %3312 = vmatprep.subr.mxu1 %v3370_v2 }
  0xca   :  { %3181 = vmatmul.mubr.msk.f32.vlgmr.msra.gmra.mxu0 %vm84_vm3, %v3639_v42  ;;  %v2711_v24 = vpop.permute.xlu0 %2710  ;;  %3313 = vmatpush3.msk.msra.mxu1 %vm88_vm1, %v2713_v23 }
  0xcb   :  { %v2715_v25 = vsel %vm1214_vm9, %v2711_v24, %v2713_v23  ;;  %3314 = vmatprep.mubr.msk.f32.mxu1 %vm3371_vm0, %v3370_v2  ;;  %2789 = vmatprep.mubr.f32.mxu0 %v3370_v2 }
  0xcc   :  { %v2873_v26 = vpop.permute.xlu1 %2872  ;;  %3185 = vmatprep.subr.msk.mxu0 %vm88_vm1, %v2715_v25  ;;  %3315 = vmatmul.mubr.msk.f32.vlgmr.msra.gmra.mxu1 %vm84_vm3, %v3653_v46 }
  0xcd   :  { %3317 = vmatprep.subr.mxu1 %v3370_v2  ;;  %3319 = vmatprep.mubr.msk.f32.mxu1 %vm3371_vm0, %v3370_v2 }
  0xce   :  { %v2709_v27 = vpop.permute.xlu0 %2708 }
  0xcf   :  { %v2714_v28 = vsel %vm1214_vm9, %v2709_v27, %v2711_v24 }
  0xd0   :  { %3186 = vmatpush1.msk.msra.mxu0 %vm88_vm1, %v2714_v28  ;;  %v2871_v29 = vpop.permute.xlu1 %2870 }
  0xd1   :  { %3187 = vmatmul.mubr.msk.f32.vlgmr.msra.gmra.mxu0 %vm84_vm3, %v3653_v46  ;;  %v2876_v32 = vsel %vm1378_vm10, %v2871_v29, %v2873_v26 }
  0xd2   :  { %v2875_v30 = vpop.permute.xlu0 %2874  ;;  %2951 = vmatprep.mubr.f32.mxu0 %v3370_v2  ;;  %v12_v2 = vlaneseq }
  0xd3   :  { %v2877_v31 = vsel %vm1378_vm10, %v2873_v26, %v2875_v30  ;;  %3318 = vmatpush3.msk.msra.mxu1 %vm88_vm1, %v2875_v30 }
  0xd4   :  { %3191 = vmatprep.subr.msk.mxu0 %vm88_vm1, %v2877_v31  ;;  %3320 = vmatmul.mubr.msk.f32.vlgmr.msra.gmra.mxu1 %vm84_vm3, %v3672_v52  ;;  %v13_v38 = vand.u32 127, %v12_v2 }
  0xd5   :  { %3192 = vmatpush1.msk.msra.mxu0 %vm88_vm1, %v2876_v32 }
  0xd6   :  { %3193 = vmatmul.mubr.msk.f32.vlgmr.msra.gmra.mxu0 %vm84_vm3, %v3672_v52  ;;  %v15_v43 = vadd.s32 256, %v13_v38  ;;  %v14_v46 = vadd.s32 128, %v13_v38  ;;  %v3802_v49 = vmul.u32.u64.low 3817748708, %v13_v38  ;;  %v3803_v50 = vmul.u32.u64.high 3817748708, %v13_v38, %v3802_v49 }
  0xd8   :  { %v3805_v52 = vmul.u32.u64.low 3817748708, %v15_v43  ;;  %v3806_v53 = vmul.u32.u64.high 3817748708, %v15_v43, %v3805_v52  ;;  %v3808_v56 = vmul.u32.u64.low 3817748708, %v14_v46  ;;  %v3809_v57 = vmul.u32.u64.high 3817748708, %v14_v46, %v3808_v56 }
  0xd9   :  { %v22_v4 = vshrl.u32 %v3803_v50, 4 }
  0xda   :  { %v44_v6 = vshrl.u32 %v3806_v53, 4  ;;  %v33_v9 = vshrl.u32 %v3809_v57, 4 }
  0xdb   :  { %v23_v12 = vmul.u32 18, %v22_v4 }
  0xdc   :  { %v45_v14 = vmul.u32 18, %v44_v6  ;;  %v34_v17 = vmul.u32 18, %v33_v9 }
  0xdd   :  { %v24_v20 = vsub.s32 %v13_v38, %v23_v12 }
  0xde   :  { %v46_v22 = vsub.s32 %v15_v43, %v45_v14  ;;  %v35_v26 = vsub.s32 %v14_v46, %v34_v17 }
  0xdf   :  { %vm49_vm11 = vcmp.ne.s32.totalorder %v24_v20, 0  ;;  %vm52_vm12 = vcmp.lt.s32.totalorder %v24_v20, 0 }
  0xe0   :  { %vm51_vm13 = vcmp.ne.s32.totalorder %v46_v22, 0  ;;  %vm54_vm14 = vcmp.lt.s32.totalorder %v46_v22, 0  ;;  %vm50_vm15 = vcmp.ne.s32.totalorder %v35_v26, 0  ;;  %vm53_vm0 = vcmp.lt.s32.totalorder %v35_v26, 0  ;;  %vm3814_vm1 = vmand %vm52_vm12, %vm49_vm11 }
  0xe1   :  { %vm3818_vm2 = vmand %vm54_vm14, %vm51_vm13  ;;  %v59_v38 = vadd.s32 18, %v35_v26 }
  0xe2   :  { %vm3822_vm3 = vmand %vm53_vm0, %vm50_vm15 }
 0x13c   :  { %v232_v33 = vpop.f32.mrf.mxu1 }
 0x13e   :  { %v161_v34 = vpop.f32.mrf.mxu0  ;;  %v3236_v35 = vpop.f32.mrf.mxu1 }
 0x13f   :  { %v60_v35 = vadd.s32 18, %v46_v22 }
 0x140   :  { %v163_v36 = vpop.f32.mrf.mxu0 }
 0x141   :  { %v382_v37 = vpop.f32.mrf.mxu1 }
 0x142   :  { %v383_v51 = vadd.f32 %v382_v37, %v232_v33  ;;  %v58_v33 = vadd.s32 18, %v24_v20 }
 0x143   :  { %v311_v39 = vpop.f32.mrf.mxu0  ;;  %v3241_v40 = vpop.f32.mrf.mxu1 }
 0x144   :  { %v312_v61 = vadd.f32 %v311_v39, %v161_v34  ;;  %v61_v43 = vsel %vm3814_vm1, %v58_v33, %v24_v20 }
 0x145   :  { %v313_v41 = vpop.f32.mrf.mxu0  ;;  %v543_v42 = vpop.f32.mrf.mxu1  ;;  %vm3832_vm4 = vcmp.lt.s32.totalorder %v61_v43, 16 }
 0x146   :  { %v549_v60 = vadd.f32 %v543_v42, %v383_v51  ;;  %v314_v0 = vadd.f32 %v313_v41, %v163_v36 }
 0x147   :  { %v472_v44 = vpop.f32.mrf.mxu0  ;;  %v3246_v45 = vpop.f32.mrf.mxu1 }
 0x148   :  { %v547_v7 = vadd.f32 %v472_v44, %v312_v61  ;;  %v63_v44 = vsel %vm3818_vm2, %v60_v35, %v46_v22 }
 0x149   :  { %v474_v47 = vpop.f32.mrf.mxu0  ;;  %v707_v48 = vpop.f32.mrf.mxu1  ;;  %vm3840_vm5 = vcmp.lt.s32.totalorder %v63_v44, 16 }
 0x14a   :  { %v713_v5 = vadd.f32 %v707_v48, %v549_v60  ;;  %v548_v10 = vadd.f32 %v474_v47, %v314_v0  ;;  %v62_v48 = vsel %vm3822_vm3, %v59_v38, %v35_v26 }
 0x14b   :  { %v636_v54 = vpop.f32.mrf.mxu0  ;;  %v3251_v55 = vpop.f32.mrf.mxu1  ;;  %vm3844_vm6 = vcmp.lt.s32.totalorder %v62_v48, 16 }
 0x14c   :  { %v711_v15 = vadd.f32 %v636_v54, %v547_v7 }
 0x14d   :  { %v638_v58 = vpop.f32.mrf.mxu0  ;;  %v871_v59 = vpop.f32.mrf.mxu1 }
 0x14e   :  { %v877_v13 = vadd.f32 %v871_v59, %v713_v5  ;;  %v712_v18 = vadd.f32 %v638_v58, %v548_v10 }
 0x14f   :  { %v800_v62 = vpop.f32.mrf.mxu0  ;;  %v3256_v63 = vpop.f32.mrf.mxu1 }
 0x150   :  { %v875_v23 = vadd.f32 %v800_v62, %v711_v15 }
 0x151   :  { %v802_v1 = vpop.f32.mrf.mxu0  ;;  %v1035_v3 = vpop.f32.mrf.mxu1 }
 0x152   :  { %v1041_v21 = vadd.f32 %v1035_v3, %v877_v13  ;;  %v876_v27 = vadd.f32 %v802_v1, %v712_v18 }
 0x153   :  { %v3261_v8 = vpop.f32.mrf.mxu1 }
 0x155   :  { %v964_v11 = vpop.f32.mrf.mxu0 }
 0x156   :  { %v1039_v30 = vadd.f32 %v964_v11, %v875_v23 }
 0x157   :  { %v966_v16 = vpop.f32.mrf.mxu0 }
 0x158   :  { %v1040_v2 = vadd.f32 %v966_v16, %v876_v27 }
 0x159   :  { %v1199_v19 = vpop.f32.mrf.mxu1 }
 0x15a   :  { %v1128_v24 = vpop.f32.mrf.mxu0  ;;  %v1205_v29 = vadd.f32 %v1199_v19, %v1041_v21 }
 0x15b   :  { %v3266_v25 = vpop.f32.mrf.mxu1  ;;  %v1203_v41 = vadd.f32 %v1128_v24, %v1039_v30 }
 0x15c   :  { %v1130_v31 = vpop.f32.mrf.mxu0 }
 0x15d   :  { %v1363_v28 = vpop.f32.mrf.mxu1  ;;  %v1204_v46 = vadd.f32 %v1130_v31, %v1040_v2 }
 0x15e   :  { %v1369_v39 = vadd.f32 %v1363_v28, %v1205_v29 }
 0x15f   :  { %v3271_v32 = vpop.f32.mrf.mxu1 }
 0x161   :  { %v1292_v36 = vpop.f32.mrf.mxu0 }
 0x162   :  { %v1367_v47 = vadd.f32 %v1292_v36, %v1203_v41 }
 0x163   :  { %v1294_v42 = vpop.f32.mrf.mxu0 }
 0x164   :  { %v1527_v45 = vpop.f32.mrf.mxu1  ;;  %v1368_v53 = vadd.f32 %v1294_v42, %v1204_v46 }
 0x165   :  { %v3836_v51 = vadd.f32 %v1527_v45, %v1369_v39 }
 0x166   :  { %v1456_v50 = vpop.f32.mrf.mxu0  ;;  %v3276_v52 = vpop.f32.mrf.mxu1 }
 0x167   :  { %v3838_v54 = vadd.f32 %v1456_v50, %v1367_v47  ;;  %v1542_v61 = vsel %vm3840_vm5, %v3836_v51, 0.0 }
 0x168   :  { %v1458_v57 = vpop.f32.mrf.mxu0  ;;  %v1743_v58 = vpop.f32.mrf.mxu1  ;;  %v1551_v5 = vmul.f32 %v1542_v61, %v1542_v61  ;;  %v1545_v7 = vsel %vm1544_vm7, %v1542_v61, 0.0 }
 0x169   :  { %v1540_v59 = vsel %vm3832_vm4, %v3838_v54, 0.0  ;;  %v3851_v60 = vadd.f32 %v1458_v57, %v1368_v53 }
 0x16a   :  { %v3281_v62 = vpop.f32.mrf.mxu1  ;;  %v1549_v0 = vmul.f32 %v1540_v59, %v1540_v59  ;;  %v1553_v13 = vsel %vm1544_vm7, %v1551_v5, 0.0 }
 0x16b   :  { %v1541_v63 = vsel %vm3844_vm6, %v3851_v60, 0.0 }
 0x16c   :  { %v1550_v1 = vmul.f32 %v1541_v63, %v1541_v63  ;;  %v1543_v3 = vadd.f32 %v1541_v63, %v1540_v59  ;;  %v1893_v4 = vpop.f32.mrf.mxu1 }
 0x16d   :  { %v1672_v6 = vpop.f32.mrf.mxu0  ;;  %v1894_v25 = vadd.f32 %v1893_v4, %v1743_v58 }
 0x16e   :  { %v1546_v8 = vadd.f32 %v1545_v7, %v1543_v3  ;;  %v1552_v9 = vadd.f32 %v1550_v1, %v1549_v0  ;;  %v3286_v10 = vpop.f32.mrf.mxu1 }
 0x16f   :  { %v1674_v11 = vpop.f32.mrf.mxu0 }
 0x170   :  { %1547 = vadd.xlane.f32.xlu0 %v1546_v8  ;;  %v1554_v15 = vadd.f32 %v1553_v13, %v1552_v9 }
 0x171   :  { %v1822_v12 = vpop.f32.mrf.mxu0  ;;  %v2052_v14 = vpop.f32.mrf.mxu1 }
 0x172   :  { %v2058_v29 = vadd.f32 %v2052_v14, %v1894_v25  ;;  %v1823_v32 = vadd.f32 %v1822_v12, %v1672_v6 }
 0x173   :  { %v1824_v16 = vpop.f32.mrf.mxu0  ;;  %v3291_v17 = vpop.f32.mrf.mxu1 }
 0x174   :  { %1555 = vadd.xlane.f32.xlu0 %v1554_v15  ;;  %v1825_v34 = vadd.f32 %v1824_v16, %v1674_v11 }
 0x175   :  { %v1981_v18 = vpop.f32.mrf.mxu0  ;;  %v2214_v19 = vpop.f32.mrf.mxu1 }
 0x176   :  { %v2220_v35 = vadd.f32 %v2214_v19, %v2058_v29  ;;  %v2056_v37 = vadd.f32 %v1981_v18, %v1823_v32 }
 0x177   :  { %v1983_v20 = vpop.f32.mrf.mxu0  ;;  %v3296_v21 = vpop.f32.mrf.mxu1 }
 0x178   :  { %v2057_v39 = vadd.f32 %v1983_v20, %v1825_v34 }
 0x179   :  { %v2143_v22 = vpop.f32.mrf.mxu0 }
 0x17a   :  { %v2218_v43 = vadd.f32 %v2143_v22, %v2056_v37 }
 0x17b   :  { %v2145_v23 = vpop.f32.mrf.mxu0 }
 0x17c   :  { %v2219_v45 = vadd.f32 %v2145_v23, %v2057_v39 }
 0x17d   :  { %v2376_v24 = vpop.f32.mrf.mxu1 }
 0x17e   :  { %v2305_v26 = vpop.f32.mrf.mxu0  ;;  %v2382_v40 = vadd.f32 %v2376_v24, %v2220_v35 }
 0x17f   :  { %v3301_v27 = vpop.f32.mrf.mxu1  ;;  %v2380_v46 = vadd.f32 %v2305_v26, %v2218_v43 }
 0x180   :  { %v2307_v30 = vpop.f32.mrf.mxu0 }
 0x181   :  { %v2538_v28 = vpop.f32.mrf.mxu1  ;;  %v2381_v50 = vadd.f32 %v2307_v30, %v2219_v45 }
 0x182   :  { %v2544_v47 = vadd.f32 %v2538_v28, %v2382_v40 }
 0x183   :  { %v3306_v31 = vpop.f32.mrf.mxu1 }
 0x185   :  { %v2467_v33 = vpop.f32.mrf.mxu0 }
 0x186   :  { %v2542_v52 = vadd.f32 %v2467_v33, %v2380_v46 }
 0x187   :  { %v2469_v2 = vpop.f32.mrf.mxu0 }
 0x188   :  { %v2700_v36 = vpop.f32.mrf.mxu1  ;;  %v2543_v58 = vadd.f32 %v2469_v2, %v2381_v50 }
 0x189   :  { %v2706_v53 = vadd.f32 %v2700_v36, %v2544_v47 }
 0x18a   :  { %v3311_v38 = vpop.f32.mrf.mxu1  ;;  %v2629_v41 = vpop.f32.mrf.mxu0 }
 0x18b   :  { %v2704_v59 = vadd.f32 %v2629_v41, %v2542_v52 }
 0x18c   :  { %v2862_v42 = vpop.f32.mrf.mxu1  ;;  %v2631_v48 = vpop.f32.mrf.mxu0 }
 0x18d   :  { %v2868_v61 = vadd.f32 %v2862_v42, %v2706_v53  ;;  %v2705_v0 = vadd.f32 %v2631_v48, %v2543_v58 }
 0x18e   :  { %v3316_v44 = vpop.f32.mrf.mxu1 }
 0x191   :  { %v2791_v57 = vpop.f32.mrf.mxu0 }
 0x192   :  { %v2866_v1 = vadd.f32 %v2791_v57, %v2704_v59 }
 0x193   :  { %v2793_v62 = vpop.f32.mrf.mxu0 }
 0x194   :  { %v3024_v63 = vpop.f32.mrf.mxu1  ;;  %v2867_v6 = vadd.f32 %v2793_v62, %v2705_v0 }
 0x195   :  { %v3861_v3 = vadd.f32 %v3024_v63, %v2868_v61 }
 0x196   :  { %v2953_v4 = vpop.f32.mrf.mxu0  ;;  %v3321_v5 = vpop.f32.mrf.mxu1 }
 0x197   :  { %v3028_v7 = vadd.f32 %v2953_v4, %v2866_v1  ;;  %v3033_v8 = vsel %vm3840_vm5, %v3861_v3, 0.0 }
 0x198   :  { %v2955_v9 = vpop.f32.mrf.mxu0  ;;  %v3041_v12 = vmul.f32 %v3033_v8, %v3033_v8  ;;  %v3035_v17 = vsel %vm1544_vm7, %v3033_v8, 0.0 }
 0x199   :  { %v3031_v10 = vsel %vm3832_vm4, %v3028_v7, 0.0  ;;  %v3029_v11 = vadd.f32 %v2955_v9, %v2867_v6 }
 0x19a   :  { %v3039_v14 = vmul.f32 %v3031_v10, %v3031_v10  ;;  %v3043_v20 = vsel %vm1544_vm7, %v3041_v12, 0.0 }
 0x19b   :  { %v3032_v13 = vsel %vm3844_vm6, %v3029_v11, 0.0 }
 0x19c   :  { %v3040_v15 = vmul.f32 %v3032_v13, %v3032_v13  ;;  %v3034_v16 = vadd.f32 %v3032_v13, %v3031_v10 }
 0x19e   :  { %v3036_v18 = vadd.f32 %v3035_v17, %v3034_v16  ;;  %v3042_v19 = vadd.f32 %v3040_v15, %v3039_v14 }
 0x1a0   :  { %3037 = vadd.xlane.f32.xlu1 %v3036_v18  ;;  %v3044_v55 = vadd.f32 %v3043_v20, %v3042_v19 }
 0x1a2   :  { %3045 = vadd.xlane.f32.xlu0 %v3044_v55 }
 0x1f9   :  { %v1548_v21 = vpop.xlane.xlu0 %1547 }
 0x1fa   :  { %v1557_v49 = vmul.f32 0.00390625, %v1548_v21 }
 0x1fc   :  { %v1559_v23 = vmul.f32 %v1557_v49, %v1557_v49  ;;  %v1561_v26 = vsub.f32 %v3838_v54, %v1557_v49  ;;  %v1562_v27 = vsub.f32 %v3851_v60, %v1557_v49  ;;  %v1563_v28 = vsub.f32 %v3836_v51, %v1557_v49 }
 0x1fd   :  { %v1556_v22 = vpop.xlane.xlu0 %1555 }
 0x1fe   :  { %v1558_v24 = vmul.f32 0.00390625, %v1556_v22 }
 0x200   :  { %v1560_v25 = vsub.f32 %v1558_v24, %v1559_v23 }
 0x202   :  { %v1564_v56 = vadd.f32 1e-05, %v1560_v25 }
 0x204   :  { %3343 = vrsqrt.f32 %v1564_v56 }
 0x211   :  { %v3344_v29 = vpop.eup %3343 }
 0x212   :  { %v1566_v30 = vmul.f32 %v3344_v29, %v1561_v26  ;;  %v1567_v31 = vmul.f32 %v3344_v29, %v1562_v27  ;;  %v1568_v32 = vmul.f32 %v3344_v29, %v1563_v28 }
 0x214   :  { %vm1569_vm8 = vcmp.ge.f32.partialorder %v1566_v30, 0.0  ;;  %vm1570_vm9 = vcmp.ge.f32.partialorder %v1567_v31, 0.0  ;;  %vm1571_vm10 = vcmp.ge.f32.partialorder %v1568_v32, 0.0  ;;  %v1572_v33 = vmul.f32 0.01, %v1566_v30 }
 0x215   :  { %v1573_v34 = vmul.f32 0.01, %v1567_v31  ;;  %v1574_v35 = vmul.f32 0.01, %v1568_v32 }
 0x216   :  { %v1575_v2 = vsel %vm1569_vm8, %v1566_v30, %v1572_v33 }
 0x217   :  { %v1576_v36 = vsel %vm1570_vm9, %v1567_v31, %v1573_v34  ;;  %v1577_v37 = vsel %vm1571_vm10, %v1568_v32, %v1574_v35  ;;  %1578 = vst [vmem:[#allocation2] sm:$0xff] %v1575_v2 }
 0x218   :  { %1579 = vst [vmem:[#allocation2 + $0x8] sm:$0xff] %v1576_v36  ;;  %1580 = vst.msk [vmem:[#allocation2 + $0x10] sm:$0xff] %vm1544_vm7, %v1577_v37 }
 0x229   :  { %v3038_v54 = vpop.xlane.xlu1 %3037 }
 0x22a   :  { %v3047_v60 = vmul.f32 0.00390625, %v3038_v54 }
 0x22b   :  { %v3046_v51 = vpop.xlane.xlu0 %3045 }
 0x22c   :  { %v3049_v38 = vmul.f32 %v3047_v60, %v3047_v60  ;;  %v3048_v39 = vmul.f32 0.00390625, %v3046_v51  ;;  %v3051_v42 = vsub.f32 %v3028_v7, %v3047_v60  ;;  %v3052_v43 = vsub.f32 %v3029_v11, %v3047_v60 }
 0x22d   :  { %v3053_v44 = vsub.f32 %v3861_v3, %v3047_v60 }
 0x22e   :  { %v3050_v40 = vsub.f32 %v3048_v39, %v3049_v38 }
 0x230   :  { %v3054_v41 = vadd.f32 1e-05, %v3050_v40 }
 0x232   :  { %3345 = vrsqrt.f32 %v3054_v41 }
 0x23f   :  { %v3346_v45 = vpop.eup %3345 }
 0x240   :  { %v3056_v46 = vmul.f32 %v3346_v45, %v3051_v42  ;;  %v3057_v47 = vmul.f32 %v3346_v45, %v3052_v43  ;;  %v3058_v48 = vmul.f32 %v3346_v45, %v3053_v44 }
 0x242   :  { %vm3059_vm11 = vcmp.ge.f32.partialorder %v3056_v46, 0.0  ;;  %vm3060_vm12 = vcmp.ge.f32.partialorder %v3057_v47, 0.0  ;;  %vm3061_vm13 = vcmp.ge.f32.partialorder %v3058_v48, 0.0  ;;  %v3062_v50 = vmul.f32 0.01, %v3056_v46 }
 0x243   :  { %v3063_v52 = vmul.f32 0.01, %v3057_v47  ;;  %v3064_v53 = vmul.f32 0.01, %v3058_v48 }
 0x244   :  { %v3065_v57 = vsel %vm3059_vm11, %v3056_v46, %v3062_v50 }
 0x245   :  { %v3066_v58 = vsel %vm3060_vm12, %v3057_v47, %v3063_v52  ;;  %v3067_v59 = vsel %vm3061_vm13, %v3058_v48, %v3064_v53  ;;  %3069 = vst [vmem:[#allocation2 + $0x18] sm:$0xff] %v3065_v57 }
 0x246   :  { %3070 = vst [vmem:[#allocation2 + $0x20] sm:$0xff] %v3066_v58  ;;  %3071 = vst.msk [vmem:[#allocation2 + $0x28] sm:$0xff] %vm1544_vm7, %v3067_v59 }
 0x247   :  { %3358 = shalt.err (!%p3355_p4)
}
 0x248   :  { %s3380_s16 = smov 384   ;;  %s3381_s17 = smov 24  }
 0x249   :  { %3083 = dma.vmem_to_hbm [thread:$0]  %s3078_s14, 768, %s3883_s2, [#allocation3], %s3380_s16, %s3380_s16, %s3381_s17  }
 0x24a   :  { %3367 = dma.done.wait [#allocation3], 768  }
 0x24b   :  { %3368 = vsyncadd [#allocation3], 4294966528 }
 0x24c   :  { %3087 = vsyncpa [#allocation3], 1 }

</bundles_post_ra>
